<compile_context>
chip_gen: v7x
topology: tpu7x:2x2x1
jax: 0.10.0
libtpu: 0.0.40
codegen_flags: <defaults>
</compile_context>

<pallas_src>
import functools

import jax
import jax.numpy as jnp
from jax.experimental import pallas as pl
from jax.experimental.pallas import tpu as pltpu

P = 128        # lane width; every feature dimension is zero-padded to this
N_FACES = 6    # dice faces used by the LUT path


def _round_up(x, m):
    return ((x + m - 1) // m) * m


def entry_selector_kernel(x_ref, w_ref, v_ref, out_ref, *,
                          n_dice, dice_off, n_tail, use_lut):
    """One batch tile of the fused forward pass.

    x_ref:   [TILE_B, 128] bf16  lanes [0:n_entries) scoreboard,
                                 lanes [dice_off:dice_off+n_dice) dice values,
                                 all other lanes explicit zeros (host-side pad).
    w_ref:   [n_slabs, 128, 128] bf16 packed weights ([in, out] layout):
               0            scoreboard-encoder weight, columns shifted by c2
               1            block-diagonal head weight (dice rows | scoreboard rows)
               2..1+n_tail  tail Linear weights
               2+n_tail     dice per-element MLP 2nd layer (exact path)
               3+n_tail     dice LUT, row f-1 = relu(mlp(f)) / n_dice (LUT path)
    v_ref:   [n_vecs, 128] f32   w_d1, b_d1, b_d2, b_enc (shifted), b_m1, tail biases
    out_ref: [TILE_B, 128] f32   lanes >= n_entries are exactly zero
    """
    tile_b = x_ref.shape[0]
    x = x_ref[...]                                   # bf16, already MXU-ready

    # ---- scoreboard encoder: Linear + ReLU, output in lanes [c2, c2+latent) ----
    # (dice lanes hit all-zero weight rows, so feeding the combined tile is safe)
    sb_emb = jnp.maximum(
        jnp.dot(x, w_ref[0], preferred_element_type=jnp.float32) + v_ref[3:4, :],
        0.0)                                          # [TILE_B, 128] f32

    # ---- dice invariantifier -> dice_feat in lanes [0, c2) ---------------------
    if use_lut:
        # Integer dice 1..6: per-dice MLP + mean pool == face histogram @ LUT
        # (mean already folded into the LUT host-side).
        faces = (jax.lax.broadcasted_iota(jnp.int32, (tile_b, P), 1)
                 .astype(jnp.float32) + 1.0)
        hist = jnp.zeros((tile_b, P), jnp.float32)
        for d in range(n_dice):
            v = x[:, dice_off + d:dice_off + d + 1].astype(jnp.float32)
            hist = hist + (faces == v).astype(jnp.float32)
        dice_feat = jnp.dot(hist.astype(jnp.bfloat16), w_ref[3 + n_tail],
                            preferred_element_type=jnp.float32)
    else:
        # General fallback: explicit per-dice MLP [1 -> c1 -> c2] + mean pool,
        # accumulated per dice (no concatenate intermediates).
        w_d1 = v_ref[0:1, :]
        b_d1 = v_ref[1:2, :]
        b_d2 = v_ref[2:3, :]
        acc = jnp.zeros((tile_b, P), jnp.float32)
        for d in range(n_dice):
            v = x[:, dice_off + d:dice_off + d + 1].astype(jnp.float32)
            h1 = jnp.maximum(v * w_d1 + b_d1, 0.0)
            acc = acc + jnp.maximum(
                jnp.dot(h1.astype(jnp.bfloat16), w_ref[2 + n_tail],
                        preferred_element_type=jnp.float32) + b_d2, 0.0)
        dice_feat = acc * (1.0 / n_dice)

    # ---- head MLP: concat([dice_feat, sb_emb]) @ W1 as ONE block-diag matmul ---
    z = (dice_feat + sb_emb).astype(jnp.bfloat16)     # disjoint nonzero lane bands
    h = jnp.maximum(
        jnp.dot(z, w_ref[1], preferred_element_type=jnp.float32) + v_ref[4:5, :],
        0.0)

    # ---- remaining Linear+ReLU layers (the reference keeps ReLU on the output) -
    for t in range(n_tail):
        h = jnp.maximum(
            jnp.dot(h.astype(jnp.bfloat16), w_ref[2 + t],
                    preferred_element_type=jnp.float32)
            + v_ref[5 + t:6 + t, :], 0.0)

    out_ref[...] = h


def entry_selector_forward(dices, scoreboards, packed_w, packed_v, n_entries,
                           *, tile_b=1024, use_lut=True):
    """dices [B, n_dice] f32, scoreboards [B, n_entries] f32 -> [B, n_entries] f32."""
    B, n_dice = dices.shape
    assert scoreboards.shape == (B, n_entries)
    n_tail = packed_v.shape[0] - 5
    assert packed_w.shape[0] == n_tail + 4
    dice_off = P - n_dice
    assert n_entries <= dice_off

    # Keep >=2 grid steps when possible so "parallel" megacore sharding has work
    # for both v7x TensorCores; keep tiles a multiple of 8 sublanes.
    tile_b = min(tile_b, _round_up(max((B + 1) // 2, 8), 8))
    tile_b = max(8, _round_up(tile_b, 8))
    b_pad = _round_up(B, tile_b)
    grid = (b_pad // tile_b,)

    # Single lane-dense bf16 input tile: scoreboard in lanes [0, n_entries), dice in
    # the top lanes, every other lane an explicit zero (never rely on VMEM padding).
    x_p = jnp.zeros((b_pad, P), jnp.bfloat16)
    x_p = x_p.at[:B, :n_entries].set(scoreboards.astype(jnp.bfloat16))
    x_p = x_p.at[:B, dice_off:dice_off + n_dice].set(dices.astype(jnp.bfloat16))

    kernel = functools.partial(entry_selector_kernel, n_dice=n_dice,
                               dice_off=dice_off, n_tail=n_tail, use_lut=use_lut)

    out = pl.pallas_call(
        kernel,
        out_shape=jax.ShapeDtypeStruct((b_pad, P), jnp.float32),
        grid=grid,
        in_specs=[
            pl.BlockSpec((tile_b, P), lambda i: (i, 0)),
            # parameters: constant index maps -> stay resident across grid steps
            pl.BlockSpec(packed_w.shape, lambda i: (0, 0, 0)),
            pl.BlockSpec(packed_v.shape, lambda i: (0, 0)),
        ],
        out_specs=pl.BlockSpec((tile_b, P), lambda i: (i, 0)),
        compiler_params=pltpu.CompilerParams(
            dimension_semantics=("parallel",),        # megacore sharding on v7x
            vmem_limit_bytes=32 * 1024 * 1024),
    )(x_p, packed_w, packed_v)
    return out[:B, :n_entries]


def init_params(key, n_entries, dice_channels, latent_dim, mlp_dims):
    """Synthetic parameters; weights stored [in, out] (transposed vs nn.Linear)."""
    c1, c2 = dice_channels  # TODO(synk): assumes a 2-layer per-dice MLP [1->c1->c2]

    def dense(k, shape):
        return jax.random.normal(k, shape, jnp.float32) / jnp.sqrt(jnp.float32(shape[0]))

    def bias(n):
        return jnp.full((1, n), 0.01, jnp.float32)

    keys = jax.random.split(key, 5 + len(mlp_dims))
    w_d1, b_d1 = dense(keys[0], (1, c1)), bias(c1)
    w_d2, b_d2 = dense(keys[1], (c1, c2)), bias(c2)
    w_enc, b_enc = dense(keys[2], (n_entries, latent_dim)), bias(latent_dim)
    w_m1d = dense(keys[3], (c2, mlp_dims[0]))
    w_m1s = dense(keys[4], (latent_dim, mlp_dims[0]))
    b_m1 = bias(mlp_dims[0])
    dims = list(mlp_dims) + [n_entries]
    tail = tuple((dense(keys[5 + i], (dims[i], dims[i + 1])), bias(dims[i + 1]))
                 for i in range(len(mlp_dims)))
    return (w_d1, b_d1, w_d2, b_d2, w_enc, b_enc, w_m1d, w_m1s, b_m1, tail)


def pack_params(params, n_dice, n_faces=N_FACES):
    """Pack all params into one bf16 [n_slabs,128,128] + one f32 [n_vecs,128]."""
    (w_d1, b_d1, w_d2, b_d2, w_enc, b_enc, w_m1d, w_m1s, b_m1, tail) = params
    c2 = w_d2.shape[1]
    latent = w_enc.shape[1]
    assert c2 + latent <= P

    def slab(entries):   # entries: list of (row_off, col_off, matrix)
        s = jnp.zeros((P, P), jnp.float32)
        for ro, co, m in entries:
            assert ro + m.shape[0] <= P and co + m.shape[1] <= P
            s = s.at[ro:ro + m.shape[0], co:co + m.shape[1]].set(m)
        return s

    # Scoreboard encoder: output columns shifted so sb_emb lands in lanes [c2, c2+latent).
    w_enc_s = slab([(0, c2, w_enc)])
    # Block-diagonal head weight: dice-feature rows [0:c2), scoreboard rows [c2:c2+latent).
    w_head = slab([(0, 0, w_m1d), (c2, 0, w_m1s)])
    # Dice LUT: row f-1 = relu(relu(f*w_d1+b_d1) @ w_d2 + b_d2) / n_dice  (mean folded in).
    faces = jnp.arange(1, n_faces + 1, dtype=jnp.float32)[:, None]
    h1 = jax.nn.relu(faces * w_d1 + b_d1)
    lut = jax.nn.relu(
        jnp.dot(h1, w_d2, precision=jax.lax.Precision.HIGHEST) + b_d2) / n_dice
    lut_s = slab([(0, 0, lut)])
    w_d2_s = slab([(0, 0, w_d2)])            # exact (non-LUT) fallback path
    tail_s = [slab([(0, 0, w)]) for (w, _) in tail]
    slabs = jnp.stack([w_enc_s, w_head] + tail_s + [w_d2_s, lut_s]).astype(jnp.bfloat16)

    def vec(off, v):
        v = jnp.reshape(v, (-1,))
        assert off + v.shape[0] <= P
        return jnp.zeros((P,), jnp.float32).at[off:off + v.shape[0]].set(v)

    vecs = [vec(0, w_d1), vec(0, b_d1), vec(0, b_d2),
            vec(c2, b_enc), vec(0, b_m1)] + [vec(0, b) for (_, b) in tail]
    return slabs, jnp.stack(vecs)


def reference_forward(dices, scoreboards, params, *, quantize=True):
    """Pure-JAX reference of the modeled architecture.

    quantize=True mirrors the kernel's precision choices (bf16 matmul weights and
    bf16 scoreboard input, f32 accumulation / elementwise), so the comparison
    validates the kernel rather than bf16 rounding of the parameters.
    """
    (w_d1, b_d1, w_d2, b_d2, w_enc, b_enc, w_m1d, w_m1s, b_m1, tail) = params
    q = (lambda a: a.astype(jnp.bfloat16).astype(jnp.float32)) if quantize else (lambda a: a)
    hp = jax.lax.Precision.HIGHEST
    relu = jax.nn.relu
    n_dice = dices.shape[1]
    sbs = q(scoreboards)
    feat = 0.0
    for i in range(n_dice):
        h1 = relu(dices[:, i:i + 1] * w_d1 + b_d1)
        feat = feat + relu(jnp.dot(h1, q(w_d2), precision=hp) + b_d2)
    feat = feat / n_dice
    sb = relu(jnp.dot(sbs, q(w_enc), precision=hp) + b_enc)
    h = relu(jnp.dot(feat, q(w_m1d), precision=hp)
             + jnp.dot(sb, q(w_m1s), precision=hp) + b_m1)
    for (w, b) in tail:
        h = relu(jnp.dot(h, q(w), precision=hp) + b)
    return h


if __name__ == "__main__":
    # Small shapes consistent with the forward pass (classic yatzy-ish sizes).
    B, N_DICE, N_ENTRIES = 64, 5, 15
    DICE_PRE_MLP_CHANNELS = [8, 16]
    LATENT_DIM = 16
    MLP_DIMS = [32, 32]

    key = jax.random.PRNGKey(0)
    k_dice, k_sb, k_params = jax.random.split(key, 3)
    dices = jax.random.randint(k_dice, (B, N_DICE), 1, 7).astype(jnp.float32)
    scoreboards = jax.random.uniform(k_sb, (B, N_ENTRIES), jnp.float32, 0.0, 50.0)

    params = init_params(k_params, N_ENTRIES, DICE_PRE_MLP_CHANNELS,
                         LATENT_DIM, MLP_DIMS)
    packed_w, packed_v = pack_params(params, N_DICE)

    ref = reference_forward(dices, scoreboards, params, quantize=True)
    # bf16 MXU operands -> a few * 2^-8 relative error vs the f32-accumulated ref.
    tol = 3e-2 * float(jnp.max(jnp.abs(ref))) + 0.5

    # Default tile_b=1024 is clamped to >=2 grid steps (here 2 x 32 rows), which
    # exercises the pipelined, megacore-parallel grid.  Check both dice paths.
    for use_lut in (True, False):
        out = entry_selector_forward(dices, scoreboards, packed_w, packed_v,
                                     N_ENTRIES, use_lut=use_lut)
        out = jax.block_until_ready(out)
        assert out.shape == (B, N_ENTRIES), out.shape
        assert out.dtype == jnp.float32
        assert bool(jnp.all(jnp.isfinite(out)))
        assert bool(jnp.all(out >= 0.0))   # reference applies ReLU on the output layer
        max_err = float(jnp.max(jnp.abs(out - ref)))
        assert max_err <= tol, (use_lut, max_err, tol)

    print("KERNEL_OK")
</pallas_src>

<mosaic_0001>
module attributes {stable_mosaic.version = 11 : i64} {
  func.func @entry_selector_kernel(%arg0: i32, %arg1: memref<32x128xbf16, #tpu.memory_space<vmem>>, %arg2: memref<6x128x128xbf16, #tpu.memory_space<vmem>>, %arg3: memref<7x128xf32, #tpu.memory_space<vmem>>, %arg4: memref<32x128xf32, #tpu.memory_space<vmem>>) attributes {dimension_semantics = [#tpu.dimension_semantics<parallel>], iteration_bounds = array<i64: 2>, scalar_prefetch = 0 : i64, scratch_operands = 0 : i64, tpu.core_type = #tpu.core_type<tc>, window_params = [{transform_indices = @transform_0, window_bounds = array<i64: 32, 128>}, {pipeline_mode = #tpu.pipeline_mode<synchronous>, transform_indices = @transform_1, window_bounds = array<i64: 6, 128, 128>}, {pipeline_mode = #tpu.pipeline_mode<synchronous>, transform_indices = @transform_2, window_bounds = array<i64: 7, 128>}, {transform_indices = @transform_3, window_bounds = array<i64: 32, 128>}]} {
    %c0 = arith.constant 0 : index
    %c0_0 = arith.constant 0 : index
    %0 = vector.load %arg1[%c0, %c0_0] : memref<32x128xbf16, #tpu.memory_space<vmem>>, vector<32x128xbf16>
    %c0_1 = arith.constant 0 : index
    %c0_2 = arith.constant 0 : index
    %c0_3 = arith.constant 0 : index
    %1 = vector.load %arg2[%c0_1, %c0_2, %c0_3] : memref<6x128x128xbf16, #tpu.memory_space<vmem>>, vector<1x128x128xbf16>
    %2 = vector.shape_cast %1 : vector<1x128x128xbf16> to vector<128x128xbf16>
    %cst = arith.constant dense<0.000000e+00> : vector<32x128xf32>
    %3 = tpu.matmul %0, %2, %cst {dimension_numbers = #tpu.dot_dimension_numbers<[1], [0], [0], [1], [0, 0, 1, 1], [], []>} : vector<32x128xbf16>, vector<128x128xbf16>, vector<32x128xf32> -> vector<32x128xf32>
    %c3 = arith.constant 3 : index
    %c0_4 = arith.constant 0 : index
    %4 = vector.load %arg3[%c3, %c0_4] : memref<7x128xf32, #tpu.memory_space<vmem>>, vector<1x128xf32>
    %5 = vector.broadcast %4 : vector<1x128xf32> to vector<32x128xf32>
    %6 = arith.addf %3, %5 : vector<32x128xf32>
    %cst_5 = arith.constant 0.000000e+00 : f32
    %7 = vector.broadcast %cst_5 : f32 to vector<32x128xf32>
    %8 = arith.maximumf %6, %7 : vector<32x128xf32>
    %9 = tpu.iota {dimensions = array<i32: 1>} : vector<32x128xi32>
    %10 = arith.sitofp %9 : vector<32x128xi32> to vector<32x128xf32>
    %cst_6 = arith.constant 1.000000e+00 : f32
    %11 = vector.broadcast %cst_6 : f32 to vector<32x128xf32>
    %12 = arith.addf %10, %11 : vector<32x128xf32>
    %cst_7 = arith.constant 0.000000e+00 : f32
    %13 = vector.broadcast %cst_7 : f32 to vector<32x128xf32>
    %14 = vector.extract_strided_slice %0 {offsets = [0, 123], sizes = [32, 1], strides = [1, 1]} : vector<32x128xbf16> to vector<32x1xbf16>
    %15 = arith.extf %14 : vector<32x1xbf16> to vector<32x1xf32>
    %16 = vector.broadcast %15 : vector<32x1xf32> to vector<32x128xf32>
    %17 = arith.cmpf oeq, %12, %16 : vector<32x128xf32>
    %18 = arith.extui %17 : vector<32x128xi1> to vector<32x128xi32>
    %19 = arith.sitofp %18 : vector<32x128xi32> to vector<32x128xf32>
    %20 = arith.addf %13, %19 : vector<32x128xf32>
    %21 = vector.extract_strided_slice %0 {offsets = [0, 124], sizes = [32, 1], strides = [1, 1]} : vector<32x128xbf16> to vector<32x1xbf16>
    %22 = arith.extf %21 : vector<32x1xbf16> to vector<32x1xf32>
    %23 = vector.broadcast %22 : vector<32x1xf32> to vector<32x128xf32>
    %24 = arith.cmpf oeq, %12, %23 : vector<32x128xf32>
    %25 = arith.extui %24 : vector<32x128xi1> to vector<32x128xi32>
    %26 = arith.sitofp %25 : vector<32x128xi32> to vector<32x128xf32>
    %27 = arith.addf %20, %26 : vector<32x128xf32>
    %28 = vector.extract_strided_slice %0 {offsets = [0, 125], sizes = [32, 1], strides = [1, 1]} : vector<32x128xbf16> to vector<32x1xbf16>
    %29 = arith.extf %28 : vector<32x1xbf16> to vector<32x1xf32>
    %30 = vector.broadcast %29 : vector<32x1xf32> to vector<32x128xf32>
    %31 = arith.cmpf oeq, %12, %30 : vector<32x128xf32>
    %32 = arith.extui %31 : vector<32x128xi1> to vector<32x128xi32>
    %33 = arith.sitofp %32 : vector<32x128xi32> to vector<32x128xf32>
    %34 = arith.addf %27, %33 : vector<32x128xf32>
    %35 = vector.extract_strided_slice %0 {offsets = [0, 126], sizes = [32, 1], strides = [1, 1]} : vector<32x128xbf16> to vector<32x1xbf16>
    %36 = arith.extf %35 : vector<32x1xbf16> to vector<32x1xf32>
    %37 = vector.broadcast %36 : vector<32x1xf32> to vector<32x128xf32>
    %38 = arith.cmpf oeq, %12, %37 : vector<32x128xf32>
    %39 = arith.extui %38 : vector<32x128xi1> to vector<32x128xi32>
    %40 = arith.sitofp %39 : vector<32x128xi32> to vector<32x128xf32>
    %41 = arith.addf %34, %40 : vector<32x128xf32>
    %42 = vector.extract_strided_slice %0 {offsets = [0, 127], sizes = [32, 1], strides = [1, 1]} : vector<32x128xbf16> to vector<32x1xbf16>
    %43 = arith.extf %42 : vector<32x1xbf16> to vector<32x1xf32>
    %44 = vector.broadcast %43 : vector<32x1xf32> to vector<32x128xf32>
    %45 = arith.cmpf oeq, %12, %44 : vector<32x128xf32>
    %46 = arith.extui %45 : vector<32x128xi1> to vector<32x128xi32>
    %47 = arith.sitofp %46 : vector<32x128xi32> to vector<32x128xf32>
    %48 = arith.addf %41, %47 : vector<32x128xf32>
    %49 = arith.truncf %48 : vector<32x128xf32> to vector<32x128xbf16>
    %c5 = arith.constant 5 : index
    %c0_8 = arith.constant 0 : index
    %c0_9 = arith.constant 0 : index
    %50 = vector.load %arg2[%c5, %c0_8, %c0_9] : memref<6x128x128xbf16, #tpu.memory_space<vmem>>, vector<1x128x128xbf16>
    %51 = vector.shape_cast %50 : vector<1x128x128xbf16> to vector<128x128xbf16>
    %cst_10 = arith.constant dense<0.000000e+00> : vector<32x128xf32>
    %52 = tpu.matmul %49, %51, %cst_10 {dimension_numbers = #tpu.dot_dimension_numbers<[1], [0], [0], [1], [0, 0, 1, 1], [], []>} : vector<32x128xbf16>, vector<128x128xbf16>, vector<32x128xf32> -> vector<32x128xf32>
    %53 = arith.addf %52, %8 : vector<32x128xf32>
    %54 = arith.truncf %53 : vector<32x128xf32> to vector<32x128xbf16>
    %c1 = arith.constant 1 : index
    %c0_11 = arith.constant 0 : index
    %c0_12 = arith.constant 0 : index
    %55 = vector.load %arg2[%c1, %c0_11, %c0_12] : memref<6x128x128xbf16, #tpu.memory_space<vmem>>, vector<1x128x128xbf16>
    %56 = vector.shape_cast %55 : vector<1x128x128xbf16> to vector<128x128xbf16>
    %cst_13 = arith.constant dense<0.000000e+00> : vector<32x128xf32>
    %57 = tpu.matmul %54, %56, %cst_13 {dimension_numbers = #tpu.dot_dimension_numbers<[1], [0], [0], [1], [0, 0, 1, 1], [], []>} : vector<32x128xbf16>, vector<128x128xbf16>, vector<32x128xf32> -> vector<32x128xf32>
    %c4 = arith.constant 4 : index
    %c0_14 = arith.constant 0 : index
    %58 = vector.load %arg3[%c4, %c0_14] : memref<7x128xf32, #tpu.memory_space<vmem>>, vector<1x128xf32>
    %59 = vector.broadcast %58 : vector<1x128xf32> to vector<32x128xf32>
    %60 = arith.addf %57, %59 : vector<32x128xf32>
    %cst_15 = arith.constant 0.000000e+00 : f32
    %61 = vector.broadcast %cst_15 : f32 to vector<32x128xf32>
    %62 = arith.maximumf %60, %61 : vector<32x128xf32>
    %63 = arith.truncf %62 : vector<32x128xf32> to vector<32x128xbf16>
    %c2 = arith.constant 2 : index
    %c0_16 = arith.constant 0 : index
    %c0_17 = arith.constant 0 : index
    %64 = vector.load %arg2[%c2, %c0_16, %c0_17] : memref<6x128x128xbf16, #tpu.memory_space<vmem>>, vector<1x128x128xbf16>
    %65 = vector.shape_cast %64 : vector<1x128x128xbf16> to vector<128x128xbf16>
    %cst_18 = arith.constant dense<0.000000e+00> : vector<32x128xf32>
    %66 = tpu.matmul %63, %65, %cst_18 {dimension_numbers = #tpu.dot_dimension_numbers<[1], [0], [0], [1], [0, 0, 1, 1], [], []>} : vector<32x128xbf16>, vector<128x128xbf16>, vector<32x128xf32> -> vector<32x128xf32>
    %c5_19 = arith.constant 5 : index
    %c0_20 = arith.constant 0 : index
    %67 = vector.load %arg3[%c5_19, %c0_20] : memref<7x128xf32, #tpu.memory_space<vmem>>, vector<1x128xf32>
    %68 = vector.broadcast %67 : vector<1x128xf32> to vector<32x128xf32>
    %69 = arith.addf %66, %68 : vector<32x128xf32>
    %cst_21 = arith.constant 0.000000e+00 : f32
    %70 = vector.broadcast %cst_21 : f32 to vector<32x128xf32>
    %71 = arith.maximumf %69, %70 : vector<32x128xf32>
    %72 = arith.truncf %71 : vector<32x128xf32> to vector<32x128xbf16>
    %c3_22 = arith.constant 3 : index
    %c0_23 = arith.constant 0 : index
    %c0_24 = arith.constant 0 : index
    %73 = vector.load %arg2[%c3_22, %c0_23, %c0_24] : memref<6x128x128xbf16, #tpu.memory_space<vmem>>, vector<1x128x128xbf16>
    %74 = vector.shape_cast %73 : vector<1x128x128xbf16> to vector<128x128xbf16>
    %cst_25 = arith.constant dense<0.000000e+00> : vector<32x128xf32>
    %75 = tpu.matmul %72, %74, %cst_25 {dimension_numbers = #tpu.dot_dimension_numbers<[1], [0], [0], [1], [0, 0, 1, 1], [], []>} : vector<32x128xbf16>, vector<128x128xbf16>, vector<32x128xf32> -> vector<32x128xf32>
    %c6 = arith.constant 6 : index
    %c0_26 = arith.constant 0 : index
    %76 = vector.load %arg3[%c6, %c0_26] : memref<7x128xf32, #tpu.memory_space<vmem>>, vector<1x128xf32>
    %77 = vector.broadcast %76 : vector<1x128xf32> to vector<32x128xf32>
    %78 = arith.addf %75, %77 : vector<32x128xf32>
    %cst_27 = arith.constant 0.000000e+00 : f32
    %79 = vector.broadcast %cst_27 : f32 to vector<32x128xf32>
    %80 = arith.maximumf %78, %79 : vector<32x128xf32>
    %c0_28 = arith.constant 0 : index
    %c0_29 = arith.constant 0 : index
    %81 = vector.load %arg4[%c0_28, %c0_29] : memref<32x128xf32, #tpu.memory_space<vmem>>, vector<32x128xf32>
    tpu.vector_store %arg4[%c0_28, %c0_29], %80 {strides = array<i32>} : memref<32x128xf32, #tpu.memory_space<vmem>>, vector<32x128xf32>,
    return
  }
  func.func @transform_0(%arg0: i32) -> (i32, i32) {
    %c0_i32 = arith.constant 0 : i32
    %c0_i32_0 = arith.constant 0 : i32
    return %arg0, %c0_i32 : i32, i32
  }
  func.func @transform_1(%arg0: i32) -> (i32, i32, i32) {
    %c0_i32 = arith.constant 0 : i32
    %c0_i32_0 = arith.constant 0 : i32
    %c0_i32_1 = arith.constant 0 : i32
    %c0_i32_2 = arith.constant 0 : i32
    return %c0_i32, %c0_i32_0, %c0_i32_1 : i32, i32, i32
  }
  func.func @transform_2(%arg0: i32) -> (i32, i32) {
    %c0_i32 = arith.constant 0 : i32
    %c0_i32_0 = arith.constant 0 : i32
    %c0_i32_1 = arith.constant 0 : i32
    return %c0_i32, %c0_i32_0 : i32, i32
  }
  func.func @transform_3(%arg0: i32) -> (i32, i32) {
    %c0_i32 = arith.constant 0 : i32
    %c0_i32_0 = arith.constant 0 : i32
    return %arg0, %c0_i32 : i32, i32
  }
}

</mosaic_0001>

<bundles_post_ra>
// kernel: tpu_custom_call.1
= control target key start
LH: loop header
LB: loop body
LE: loop exit
PB: predicated region body
PF: predicated region fallthrough
CT: control target
= control target key end

     0   :  { %8 = vsyncpa [#allocation3], 0  ;;  %s2055_s0 = inlined_call_operand.hbm [shape: bf16[64,128], index: 0, kind: input, shape index: {}]   ;;  %s2056_s1 = inlined_call_operand.hbm [shape: bf16[6,128,128], index: 1, kind: input, shape index: {}]   ;;  %s2057_s2 = inlined_call_operand.hbm [shape: f32[7,128], index: 2, kind: input, shape index: {}]   ;;  %s2058_s3 = inlined_call_operand.hbm [shape: f32[64,128], index: 3, kind: output, shape index: {}]  }
   0x1   :  { %10 = vsyncpa [#allocation3 + $0x1], 0 }
   0x2   :  { %11 = vsyncpa [#allocation6], 0 }
   0x3   :  { %12 = vsyncpa [#allocation4], 0 }
   0x4   :  { %14 = vsyncpa [#allocation4 + $0x1], 0  ;;  %s1738_s12 = smov 0   ;;  %s1740_s13 = smov 0  }
   0x5   :  { %s1742_s14 = smov 0   ;;  %s1744_s15 = smov 0  }
   0x6 LB: > { %s1759_s16 = sadd.s32 4294967295, %s1702_s15   ;;  %s1130_s17 = sadd.s32 4294967294, %s1702_s15   ;;  %s1702_s15 = sphi %s1744_s15, %s2086_s15   ;;  %s1698_s14 = sphi %s1742_s14, %s2085_s14   ;;  %s1694_s13 = sphi %s1740_s13, %s2084_s13   ;;  %s1690_s12 = sphi %s1738_s12, %s2083_s12  }
   0x7   : > { %p40_p0 = scmp.ne.s32.totalorder %s1694_s13, %s1690_s12  ;;  %p2059_p1 = scmp.eq.s32.totalorder %s1759_s16, 0 }
   0x8   : > { %p112_p3 = scmp.eq.s32.totalorder %s1130_s17, 1  ;;  %p1131_p5 = scmp.ge.s32.totalorder %s1702_s15, 1 }
   0x9   : > { %p1768_p4 = por %p2059_p1, %p40_p0  ;;  %p119_p7 = scmp.lt.s32.totalorder %s1702_s15, 3 }
   0xa   : > { %p1773_p6 = por %p112_p3, %p40_p0  ;;  %s1704_s21 = smov [#allocation5]  }
   0xb   : > { %s2062_s18 = scalar_select %p1768_p4, 1, 0 }
   0xc   : > { %s2063_s19 = scalar_select %p1773_p6, 1, 0 }
   0xd   : > { %p1778_p8 = pnand %p1131_p5, %p119_p7  ;;  %s131_s22 = sshll.u32 %s1704_s21, 4  ;;  %s1782_s22 = int_to_ptr.vmem [resolvable:$true] %s131_s22 }
   0xe   : > { %s1705_s24 = smov [#allocation7]   ;;  %s1546_s28 = scalar_lea.hbm %s2056_s1, 6144 }
   0xf   : > { %p1378_p9 = pneg %p1778_p8  ;;  %s145_s25 = sshll.u32 %s1705_s24, 4  ;;  %s1793_s25 = int_to_ptr.vmem [resolvable:$true] %s145_s25 }
  0x10   : > { %p1547_p12 = scmp.ne.s32.totalorder %s2056_s1, %s1546_s28  ;;  %p1553_p5 = scmp.lt.u32.totalorder %s1546_s28, %s2056_s1 }
  0x11   : > { %p1789_p11 = pnand %p1378_p9, %p2059_p1 }
  0x13   : > { %p1548_p13 = pneg %p1789_p11 }
  0x15   : > { %p1549_p0 = pnand %p1548_p13, %p1547_p12 }
  0x17   : > { %p1550_p3 = pneg %p1549_p0 }
  0x19   : > { %p1555_p7 = pnand %p1553_p5, %p1550_p3 }
  0x1b   : > { %1558 = shalt.err (!%p1555_p7)
}
  0x1c   : > { %s1559_s6 = scalar_lea.vmem %s1782_s22, 6144  ;;  %p1567_p2 = scmp.lt.s32.totalorder %s1782_s22, %s1782_s22 }
  0x1d   : > { %p1560_p9 = scmp.ne.s32.totalorder %s1782_s22, %s1559_s6  ;;  %p1568_p12 = scmp.lt.s32.totalorder %s1559_s6, %s1559_s6 }
  0x1f   : > { %p1562_p10 = pnand %p1560_p9, %p1548_p13  ;;  %p1569_p0 = por %p1568_p12, %p1567_p2 }
  0x21   : > { %p1563_p1 = pneg %p1562_p10 }
  0x23   : > { %p1570_p6 = pnand %p1569_p0, %p1563_p1 }
  0x25   : > { %1573 = shalt.err (!%p1570_p6)
}
  0x26   : > { %s1706_s7 = smov 64   ;;  %s1707_s8 = smov 4  }
  0x27   : > { %1381 = dma.hbm_to_vmem [thread:$0]  (!%p1789_p11), %s2056_s1, 6144, %s1782_s22, [#allocation6], %s1706_s7, %s1706_s7, %s1707_s8  }
  0x28   : > { %s1574_s21 = scalar_lea.hbm %s2057_s2, 128 }
  0x29   : > { %p1575_p1 = scmp.ne.s32.totalorder %s2057_s2, %s1574_s21  ;;  %p1581_p10 = scmp.lt.u32.totalorder %s1574_s21, %s2057_s2 }
  0x2b   : > { %p1577_p2 = pnand %p1575_p1, %p1548_p13 }
  0x2d   : > { %p1578_p6 = pneg %p1577_p2 }
  0x2f   : > { %p1583_p3 = pnand %p1581_p10, %p1578_p6 }
  0x31   : > { %1586 = shalt.err (!%p1583_p3)
}
  0x32   : > { %s1587_s22 = scalar_lea.vmem %s1793_s25, 128  ;;  %p1595_p12 = scmp.lt.s32.totalorder %s1793_s25, %s1793_s25 }
  0x33   : > { %p1588_p5 = scmp.ne.s32.totalorder %s1793_s25, %s1587_s22  ;;  %p1596_p0 = scmp.lt.s32.totalorder %s1587_s22, %s1587_s22 }
  0x35   : > { %p1590_p7 = pnand %p1588_p5, %p1548_p13  ;;  %p1597_p1 = por %p1596_p0, %p1595_p12 }
  0x37   : > { %p1591_p9 = pneg %p1590_p7 }
  0x39   : > { %p1598_p2 = pnand %p1597_p1, %p1591_p9 }
  0x3b   : > { %1601 = shalt.err (!%p1598_p2)
}
  0x3c   : > { %1384 = dma.hbm_to_vmem [thread:$0]  (!%p1789_p11), %s2057_s2, 128, %s1793_s25, [#allocation6]  }
  0x3d   : > { %s1851_s4 = sadd.s32 1, %s1702_s15   ;;  %s27_s23 = sadd.s32 1, %s1698_s14 }
  0x3e   : > { %s24_s5 = ssub.s32 %s1702_s15, %s1851_s4  ;;  %p34_p13 = scmp.ne.s32.totalorder %s1698_s14, %s1694_s13 }
  0x3f   : > { %p25_p6 = scmp.eq.s32.totalorder %s24_s5, 0  ;;  %p35_p10 = scmp.eq.s32.totalorder %s1702_s15, 0 }
  0x40   : > { %p2066_p3 = scmp.eq.s32.totalorder %s1759_s16, 1  ;;  %p1395_p7 = scmp.lt.s32.totalorder %s1702_s15, 2 }
  0x41   : > { %s1867_s9 = scalar_select %p25_p6, %s1698_s14, %s27_s23  }
  0x42   : > { %p1861_p5 = por %p2066_p3, %p34_p13  ;;  %p36_p9 = por %p35_p10, %p34_p13 }
  0x43   : > { %s156_s10 = sand.u32 1, %s1698_s14   ;;  %s1214_s25 = sshll.u32 %s1702_s15, 8 }
  0x44   : > { %s2067_s6 = scalar_select %p1861_p5, 1, 0 }
  0x45   : > { %s1135_s11 = sshll.u32 %s156_s10, 4  ;;  %s1874_s24 = scalar_lea.hbm %s2055_s0, %s1214_s25 }
  0x46   : > { %s160_s26 = scalar_lea.vmem [#allocation2], %s1135_s11  ;;  %p1878_p11 = pnand %p1395_p7, %p36_p9 }
  0x47   : > { %s167_s27 = sshll.u32 %s160_s26, 4  ;;  %s1882_s22 = scalar_lea.sflag [#allocation3], %s156_s10  ;;  %s1876_s27 = int_to_ptr.vmem [resolvable:$true] %s167_s27 }
  0x48   : > { %s1602_s29 = scalar_lea.hbm %s1874_s24, 256  ;;  %p1604_p0 = pneg %p1878_p11 }
  0x49   : > { %p1603_p12 = scmp.ne.s32.totalorder %s1874_s24, %s1602_s29  ;;  %s1607_s5 = scalar_lea.hbm %s2055_s0, 512 }
  0x4a   : > { %p1608_p13 = scmp.lt.u32.totalorder %s1874_s24, %s2055_s0  ;;  %p1609_p6 = scmp.lt.u32.totalorder %s1607_s5, %s1602_s29 }
  0x4b   : > { %p1605_p1 = pnand %p1604_p0, %p1603_p12  ;;  %p1611_p3 = scmp.lt.u32.totalorder %s1602_s29, %s1874_s24 }
  0x4c   : > { %p1610_p10 = por %p1609_p6, %p1608_p13 }
  0x4d   : > { %p1606_p2 = pneg %p1605_p1 }
  0x4e   : > { %p1612_p7 = por %p1611_p3, %p1610_p10 }
  0x50   : > { %p1613_p9 = pnand %p1612_p7, %p1606_p2 }
  0x52   : > { %1616 = shalt.err (!%p1613_p9)
}
  0x53   : > { %s1617_s10 = scalar_lea.vmem %s1876_s27, 256  ;;  %s1708_s17 = smov [#allocation2]  }
  0x54   : > { %p1618_p12 = scmp.ne.s32.totalorder %s1876_s27, %s1617_s10  ;;  %s1622_s21 = sshll.u32 %s1708_s17, 4  ;;  %s1623_s21 = int_to_ptr.vmem [resolvable:$false] %s1622_s21 }
  0x55   : > { %s1624_s26 = scalar_lea.vmem %s1623_s21, 512  ;;  %p1625_p4 = scmp.lt.s32.totalorder %s1876_s27, %s1623_s21 }
  0x56   : > { %p1620_p1 = pnand %p1618_p12, %p1604_p0  ;;  %p1626_p13 = scmp.lt.s32.totalorder %s1624_s26, %s1617_s10 }
  0x58   : > { %p1621_p5 = pneg %p1620_p1  ;;  %p1627_p6 = por %p1626_p13, %p1625_p4 }
  0x5a   : > { %p1628_p10 = pnand %p1627_p6, %p1621_p5 }
  0x5c   : > { %1631 = shalt.err (!%p1628_p10)
}
  0x5d   : > { %1388 = dma.hbm_to_vmem [thread:$0]  (!%p1878_p11), %s1874_s24, 256, %s1876_s27, %s1882_s22, %s1706_s7, %s1706_s7, %s1707_s8  }
  0x5e   : > { %179 = sbr.rel (%p1778_p8) target bundleno = 1168 (0x490), region = 32  ;;  %s1916_s29 = sand.u32 (!%p1778_p8), 1, %s1694_s13  }
  0x5f   : > { %s1139_s30 = sshll.u32 (!%p1778_p8), %s1916_s29, 4  ;;  %s182_s23 = scalar_lea.sflag (!%p1778_p8), [#allocation3], %s1916_s29 }
  0x60   : > { %s185_s5 = scalar_lea.vmem (!%p1778_p8), [#allocation2], %s1139_s30  ;;  %p2069_p4 = scmp.ne.s32.totalorder (!%p1778_p8), %s2062_s18, 0 }
  0x65   : > { %1677 = dma.done.wait (%p2069_p4), %s182_s23, 256  }
  0x66   : > { %1679 = vsyncadd (%p2069_p4), %s182_s23, 4294967040  ;;  %p2070_p5 = scmp.eq.s32.totalorder %s1759_s16, 0 }
  0x68   : > { %1681 = dma.done.wait (%p2070_p5), [#allocation6], 6272   ;;  %p2071_p11 = pmov %p2070_p5 }
  0x69   : > { %v1709_v0 = vmov 123   ;;  %v1928_v1 = vld [vmem:[%s185_s5 + $0x8] sm:$0xff]   ;;  %v1930_v2 = vld [vmem:[%s185_s5] sm:$0xff]   ;;  %v1710_v15 = vmov 124   ;;  %v1711_v18 = vmov 125   ;;  %v1712_v21 = vmov 126  }
  0x6a   : > { %1683 = vsyncadd (%p2071_p11), [#allocation6], 4294961024  ;;  %1455 = vset.pattern.permute.xlu1 %v1709_v0  ;;  %1443 = vset.pattern.permute.xlu0 %v1709_v0  ;;  %v363_v3 = vunpack.c.l.bf16 %v1928_v1  ;;  %v364_v4 = vunpack.c.h.bf16 %v1928_v1  ;;  %v361_v5 = vunpack.c.l.bf16 %v1930_v2  ;;  %v362_v6 = vunpack.c.h.bf16 %v1930_v2  ;;  %v1502_v7 = vld [vmem:[#allocation5] sm:$0xff]   ;;  %v1503_v8 = vld [vmem:[#allocation5 + $0x8] sm:$0xff]   ;;  %s1142_s18 = sshll.u32 %s1916_s29, 5  ;;  %s1215_s8 = sshll.u32 %s1759_s16, 9 }
  0x6b   : > { %1266 = vmatprep.subr.bf16.mxu0 %v1502_v7  ;;  %v1504_v11 = vld [vmem:[#allocation5 + $0x140] sm:$0xff]   ;;  %v1505_v12 = vld [vmem:[#allocation5 + $0x10] sm:$0xff]   ;;  %v1506_v13 = vld [vmem:[#allocation5 + $0x148] sm:$0xff]   ;;  %v1713_v22 = vmov 127   ;;  %1282 = vmatprep.mubr.bf16.mxu0 %v1930_v2  ;;  %v357_v34 = vlaneseq  ;;  %v1714_v49 = vmov 0.0   ;;  %s215_s20 = scalar_lea.vmem [#allocation8], %s1142_s18  ;;  %s2011_s28 = scalar_lea.hbm %s2058_s3, %s1215_s8 }
  0x6c   : > { %v1456_v9 = vpack.i.bf16 %v364_v4, %v363_v3  ;;  %v1444_v10 = vpack.i.bf16 %v362_v6, %v361_v5  ;;  %1267 = vmatpush3.bf16.msra.mxu0 %v1502_v7  ;;  %1286 = vmatprep.subr.bf16.mxu1 %v1504_v11  ;;  %v1507_v14 = vld [vmem:[#allocation5 + $0x18] sm:$0xff]   ;;  %v1508_v16 = vld [vmem:[#allocation5 + $0x150] sm:$0xff]   ;;  %v1509_v17 = vld [vmem:[#allocation5 + $0x20] sm:$0xff]   ;;  %s1038_s7 = sshll.u32 %s215_s20, 4  ;;  %s1025_s16 = scalar_lea.sflag [#allocation4], %s1916_s29  ;;  %s2006_s7 = int_to_ptr.vmem [resolvable:$true] %s1038_s7 }
  0x6d   : > { %1268 = vmatprep.subr.bf16.mxu0 %v1503_v8  ;;  %1287 = vmatpush3.bf16.msra.mxu1 %v1504_v11  ;;  %v1510_v19 = vld [vmem:[#allocation5 + $0x158] sm:$0xff]   ;;  %v1511_v20 = vld [vmem:[#allocation5 + $0x28] sm:$0xff]   ;;  %v1512_v23 = vld [vmem:[#allocation5 + $0x160] sm:$0xff]   ;;  %v358_v36 = vand.u32 127, %v357_v34  ;;  %s1632_s22 = scalar_lea.vmem %s2006_s7, 512  ;;  %p2080_p0 = scmp.ne.s32.totalorder %s2067_s6, 0 }
  0x6e   : > { %1457 = vperm.xlu1 %1455, %v1456_v9   ;;  %1445 = vperm.xlu0 %1443, %v1444_v10   ;;  %v1513_v24 = vld [vmem:[#allocation5 + $0x30] sm:$0xff]   ;;  %v1514_v25 = vld [vmem:[#allocation5 + $0x168] sm:$0xff]   ;;  %v1515_v26 = vld [vmem:[#allocation5 + $0x38] sm:$0xff]   ;;  %p1633_p8 = scmp.ne.s32.totalorder %s2006_s7, %s1632_s22  ;;  %s1715_s11 = smov [#allocation8]  }
  0x6f   : > { %1288 = vmatprep.subr.bf16.mxu1 %v1506_v13  ;;  %v1517_v27 = vld [vmem:[#allocation5 + $0x170] sm:$0xff]   ;;  %v1519_v28 = vld [vmem:[#allocation5 + $0x178] sm:$0xff]   ;;  %v1520_v29 = vld [vmem:[#allocation5 + $0x40] sm:$0xff]   ;;  %v359_v37 = vcvt.s32.f32 %v358_v36  ;;  %s1636_s25 = sshll.u32 %s1715_s11, 4  ;;  %s1637_s25 = int_to_ptr.vmem [resolvable:$false] %s1636_s25 }
  0x70   : > { %1269 = vmatpush3.bf16.msra.mxu0 %v1503_v8  ;;  %v1521_v30 = vld [vmem:[#allocation5 + $0x48] sm:$0xff]   ;;  %v1522_v31 = vld [vmem:[#allocation5 + $0x50] sm:$0xff]   ;;  %v1523_v32 = vld [vmem:[#allocation5 + $0x58] sm:$0xff]   ;;  %p1634_p2 = pnand %p1633_p8, %p2080_p0  ;;  %s1638_s10 = scalar_lea.vmem %s1637_s25, 1024 }
  0x71   : > { %1270 = vmatprep.subr.bf16.mxu0 %v1505_v12  ;;  %1289 = vmatpush3.bf16.msra.mxu1 %v1506_v13  ;;  %v1524_v33 = vld [vmem:[#allocation5 + $0x60] sm:$0xff]   ;;  %v1525_v35 = vld [vmem:[#allocation5 + $0x68] sm:$0xff]   ;;  %v1938_v42 = vadd.f32 1.0, %v359_v37  ;;  %p1639_p7 = scmp.lt.s32.totalorder %s2006_s7, %s1637_s25  ;;  %p1640_p9 = scmp.lt.s32.totalorder %s1638_s10, %s1632_s22 }
  0x72   : > { %1461 = vset.pattern.permute.xlu1 %v1710_v15  ;;  %1449 = vset.pattern.permute.xlu0 %v1710_v15  ;;  %v1534_v15 = vld [vmem:[#allocation5 + $0xb0] sm:$0xff]   ;;  %p1635_p3 = pneg %p1634_p2 }
  0x73   : > { %1463 = vperm.xlu1 %1461, %v1456_v9   ;;  %1451 = vperm.xlu0 %1449, %v1444_v10   ;;  %p1641_p12 = por %p1640_p9, %p1639_p7 }
  0x74   : > { %1271 = vmatpush3.bf16.msra.mxu0 %v1505_v12  ;;  %1290 = vmatprep.subr.bf16.mxu1 %v1508_v16 }
  0x75   : > { %1272 = vmatprep.subr.bf16.mxu0 %v1507_v14  ;;  %1291 = vmatpush3.bf16.msra.mxu1 %v1508_v16  ;;  %p1642_p1 = pnand %p1641_p12, %p1635_p3 }
  0x76   : > { %1292 = vmatprep.subr.bf16.mxu1 %v1510_v19 }
  0x77   : > { %1467 = vset.pattern.permute.xlu1 %v1711_v18  ;;  %1473 = vset.pattern.permute.xlu0 %v1711_v18 }
  0x78   : > { %1469 = vperm.xlu1 %1467, %v1444_v10   ;;  %1475 = vperm.xlu0 %1473, %v1456_v9  }
  0x79   : > { %1273 = vmatpush3.bf16.msra.mxu0 %v1507_v14  ;;  %1293 = vmatpush3.bf16.msra.mxu1 %v1510_v19 }
  0x7a   : > { %1274 = vmatprep.subr.bf16.mxu0 %v1509_v17  ;;  %1294 = vmatprep.subr.bf16.mxu1 %v1512_v23 }
  0x7c   : > { %1479 = vset.pattern.permute.xlu1 %v1712_v21  ;;  %1490 = vset.pattern.permute.xlu0 %v1713_v22 }
  0x7d   : > { %1481 = vperm.xlu1 %1479, %v1444_v10   ;;  %1492 = vperm.xlu0 %1490, %v1444_v10  }
  0x7e   : > { %1275 = vmatpush3.bf16.msra.mxu0 %v1509_v17  ;;  %1295 = vmatpush3.bf16.msra.mxu1 %v1512_v23 }
  0x7f   : > { %1276 = vmatprep.subr.bf16.mxu0 %v1511_v20  ;;  %1296 = vmatprep.subr.bf16.mxu1 %v1514_v25 }
  0x81   : > { %1486 = vperm.xlu1 %1479, %v1456_v9  }
  0x82   : > { %1277 = vmatpush3.bf16.msra.mxu0 %v1511_v20  ;;  %1297 = vmatpush3.bf16.msra.mxu1 %v1514_v25 }
  0x83   : > { %1278 = vmatprep.subr.bf16.mxu0 %v1513_v24  ;;  %1298 = vmatprep.subr.bf16.mxu1 %v1517_v27 }
  0x85   : > { %1496 = vset.pattern.permute.xlu1 %v1713_v22 }
  0x86   : > { %1498 = vperm.xlu1 %1496, %v1456_v9   ;;  %1279 = vmatpush3.bf16.msra.mxu0 %v1513_v24 }
  0x87   : > { %1280 = vmatprep.subr.bf16.mxu0 %v1515_v26  ;;  %1299 = vmatpush3.bf16.msra.mxu1 %v1517_v27 }
  0x88   : > { %1300 = vmatprep.subr.bf16.mxu1 %v1519_v28 }
  0x8a   : > { %1281 = vmatpush3.bf16.msra.mxu0 %v1515_v26 }
  0x8b   : > { %1301 = vmatpush3.bf16.msra.mxu1 %v1519_v28  ;;  %1306 = vmatprep.subr.bf16.mxu0 %v1520_v29 }
  0x8d   : > { %1283 = vmatmul.mubr.bf16.vlgmr.msra.gmra.mrb[0].mxu0 %v1928_v1 }
  0x8e   : > { %1307 = vmatpush3.bf16.msra.mxu0 %v1520_v29 }
  0x8f   : > { %1308 = vmatprep.subr.bf16.mxu0 %v1521_v30 }
  0x92   : > { %1309 = vmatpush3.bf16.msra.mxu0 %v1521_v30 }
  0x93   : > { %1310 = vmatprep.subr.bf16.mxu0 %v1522_v31 }
  0x96   : > { %1311 = vmatpush3.bf16.msra.mxu0 %v1522_v31 }
  0x97   : > { %1312 = vmatprep.subr.bf16.mxu0 %v1523_v32 }
  0x9a   : > { %1313 = vmatpush3.bf16.msra.mxu0 %v1523_v32 }
  0x9b   : > { %1314 = vmatprep.subr.bf16.mxu0 %v1524_v33 }
  0x9e   : > { %1315 = vmatpush3.bf16.msra.mxu0 %v1524_v33 }
  0x9f   : > { %1316 = vmatprep.subr.bf16.mxu0 %v1525_v35 }
  0xa2   : > { %1317 = vmatpush3.bf16.msra.mxu0 %v1525_v35 }
  0xed   : > { %v1458_v38 = vpop.permute.xlu1 %1457  ;;  %v1446_v39 = vpop.permute.xlu0 %1445 }
  0xee   : > { %v1448_v40 = vunpack.i.h.bf16 %v1446_v39  ;;  %v1447_v41 = vunpack.i.l.bf16 %v1446_v39  ;;  %v1460_v56 = vunpack.i.h.bf16 %v1458_v38  ;;  %v1459_v57 = vunpack.i.l.bf16 %v1458_v38 }
  0xf0   : > { %vm386_vm0 = vcmp.eq.f32.partialorder %v1938_v42, %v1448_v40  ;;  %vm385_vm1 = vcmp.eq.f32.partialorder %v1938_v42, %v1447_v41  ;;  %vm1955_vm8 = vcmp.eq.f32.partialorder %v1938_v42, %v1460_v56  ;;  %vm1960_vm9 = vcmp.eq.f32.partialorder %v1938_v42, %v1459_v57  ;;  %v1528_v56 = vld [vmem:[#allocation5 + $0x80] sm:$0xff]   ;;  %v1531_v57 = vld [vmem:[#allocation5 + $0x98] sm:$0xff]  }
  0xf1   : > { %v1155_v50 = vsel %vm386_vm0, 1.0, %v1714_v49  ;;  %v1154_v51 = vsel %vm385_vm1, 1.0, %v1714_v49  ;;  %v1157_v25 = vsel %vm1955_vm8, 1.0, %v1714_v49  ;;  %v1156_v26 = vsel %vm1960_vm9, 1.0, %v1714_v49  ;;  %1326 = vmatprep.subr.bf16.mxu1 %v1528_v56 }
  0xf2   : > { %v1464_v43 = vpop.permute.xlu1 %1463  ;;  %v1452_v44 = vpop.permute.xlu0 %1451 }
  0xf3   : > { %v1454_v45 = vunpack.i.h.bf16 %v1452_v44  ;;  %v1453_v46 = vunpack.i.l.bf16 %v1452_v44  ;;  %v1466_v47 = vunpack.i.h.bf16 %v1464_v43  ;;  %v1465_v48 = vunpack.i.l.bf16 %v1464_v43 }
  0xf5   : > { %vm418_vm2 = vcmp.eq.f32.partialorder %v1938_v42, %v1454_v45  ;;  %vm417_vm3 = vcmp.eq.f32.partialorder %v1938_v42, %v1453_v46  ;;  %vm420_vm4 = vcmp.eq.f32.partialorder %v1938_v42, %v1466_v47  ;;  %vm419_vm5 = vcmp.eq.f32.partialorder %v1938_v42, %v1465_v48 }
  0xf6   : > { %v1159_v52 = vsel %vm418_vm2, 1.0, %v1714_v49  ;;  %v1158_v53 = vsel %vm417_vm3, 1.0, %v1714_v49  ;;  %v1161_v4 = vsel %vm420_vm4, 1.0, %v1714_v49  ;;  %v1160_v5 = vsel %vm419_vm5, 1.0, %v1714_v49 }
  0xf7   : > { %v1470_v54 = vpop.permute.xlu1 %1469  ;;  %v1476_v55 = vpop.permute.xlu0 %1475  ;;  %v429_v60 = vadd.f32 %v1158_v53, %v1154_v51  ;;  %v430_v61 = vadd.f32 %v1159_v52, %v1155_v50  ;;  %v431_v31 = vadd.f32 %v1160_v5, %v1156_v26  ;;  %v432_v32 = vadd.f32 %v1161_v4, %v1157_v25  ;;  %v1526_v51 = vld [vmem:[#allocation5 + $0x70] sm:$0xff]  }
  0xf8   : > { %v1472_v58 = vunpack.i.h.bf16 %v1470_v54  ;;  %v1471_v59 = vunpack.i.l.bf16 %v1470_v54  ;;  %v1478_v62 = vunpack.i.h.bf16 %v1476_v55  ;;  %v1477_v63 = vunpack.i.l.bf16 %v1476_v55  ;;  %1318 = vmatprep.subr.bf16.mxu0 %v1526_v51  ;;  %v1527_v55 = vld [vmem:[#allocation5 + $0x78] sm:$0xff]  }
  0xf9   : > { %1319 = vmatpush3.bf16.msra.mxu0 %v1526_v51 }
  0xfa   : > { %vm450_vm6 = vcmp.eq.f32.partialorder %v1938_v42, %v1472_v58  ;;  %vm449_vm7 = vcmp.eq.f32.partialorder %v1938_v42, %v1471_v59  ;;  %vm1967_vm10 = vcmp.eq.f32.partialorder %v1938_v42, %v1478_v62  ;;  %vm1972_vm11 = vcmp.eq.f32.partialorder %v1938_v42, %v1477_v63  ;;  %1320 = vmatprep.subr.bf16.mxu0 %v1527_v55  ;;  %v1532_v58 = vld [vmem:[#allocation5 + $0xa0] sm:$0xff]   ;;  %v1533_v59 = vld [vmem:[#allocation5 + $0xa8] sm:$0xff]  }
  0xfb   : > { %v1163_v0 = vsel %vm450_vm6, 1.0, %v1714_v49  ;;  %v1162_v1 = vsel %vm449_vm7, 1.0, %v1714_v49  ;;  %v1165_v27 = vsel %vm1967_vm10, 1.0, %v1714_v49  ;;  %v1164_v28 = vsel %vm1972_vm11, 1.0, %v1714_v49 }
  0xfc   : > { %v1482_v6 = vpop.permute.xlu1 %1481  ;;  %v1493_v7 = vpop.permute.xlu0 %1492  ;;  %v461_v12 = vadd.f32 %v1162_v1, %v429_v60  ;;  %v462_v13 = vadd.f32 %v1163_v0, %v430_v61  ;;  %v464_v37 = vadd.f32 %v1165_v27, %v432_v32  ;;  %v463_v38 = vadd.f32 %v1164_v28, %v431_v31  ;;  %v1143_v60 = vld [vmem:[#allocation7 + $0x3] ss:$0 sm:$0xff] }
  0xfd   : > { %v1484_v8 = vunpack.i.h.bf16 %v1482_v6  ;;  %v1483_v9 = vunpack.i.l.bf16 %v1482_v6  ;;  %v1495_v10 = vunpack.i.h.bf16 %v1493_v7  ;;  %v1494_v11 = vunpack.i.l.bf16 %v1493_v7  ;;  %1321 = vmatpush3.bf16.msra.mxu0 %v1527_v55 }
  0xff   : > { %vm482_vm12 = vcmp.eq.f32.partialorder %v1938_v42, %v1484_v8  ;;  %vm481_vm13 = vcmp.eq.f32.partialorder %v1938_v42, %v1483_v9  ;;  %vm514_vm14 = vcmp.eq.f32.partialorder %v1938_v42, %v1495_v10  ;;  %vm513_vm15 = vcmp.eq.f32.partialorder %v1938_v42, %v1494_v11 }
 0x100   : > { %v1167_v16 = vsel %vm482_vm12, 1.0, %v1714_v49  ;;  %v1166_v17 = vsel %vm481_vm13, 1.0, %v1714_v49  ;;  %v1487_v18 = vpop.permute.xlu1 %1486  ;;  %v1170_v19 = vsel %vm513_vm15, 1.0, %v1714_v49  ;;  %v1171_v20 = vsel %vm514_vm14, 1.0, %v1714_v49 }
 0x101   : > { %v1489_v21 = vunpack.i.h.bf16 %v1487_v18  ;;  %v1488_v22 = vunpack.i.l.bf16 %v1487_v18  ;;  %v493_v23 = vadd.f32 %v1166_v17, %v461_v12  ;;  %v494_v24 = vadd.f32 %v1167_v16, %v462_v13  ;;  %v1535_v16 = vld [vmem:[#allocation5 + $0xb8] sm:$0xff]   ;;  %v1536_v17 = vld [vmem:[#allocation5 + $0xc0] sm:$0xff]   ;;  %v1537_v18 = vld [vmem:[#allocation5 + $0xc8] sm:$0xff]  }
 0x102   : > { %1346 = vmatprep.subr.bf16.mxu0 %v1536_v17 }
 0x103   : > { %vm484_vm0 = vcmp.eq.f32.partialorder %v1938_v42, %v1489_v21  ;;  %vm483_vm1 = vcmp.eq.f32.partialorder %v1938_v42, %v1488_v22  ;;  %v525_v29 = vadd.f32 %v1170_v19, %v493_v23  ;;  %v526_v30 = vadd.f32 %v1171_v20, %v494_v24  ;;  %v1538_v19 = vld [vmem:[#allocation5 + $0xd0] sm:$0xff]   ;;  %v1539_v20 = vld [vmem:[#allocation5 + $0xd8] sm:$0xff]   ;;  %v1540_v21 = vld [vmem:[#allocation5 + $0xe0] sm:$0xff]  }
 0x104   : > { %v1169_v33 = vsel %vm484_vm0, 1.0, %v1714_v49  ;;  %v1168_v34 = vsel %vm483_vm1, 1.0, %v1714_v49  ;;  %v1541_v22 = vld [vmem:[#allocation5 + $0xe8] sm:$0xff]   ;;  %v1182_v23 = vld [vmem:[#allocation7 + $0x4] ss:$0 sm:$0xff] }
 0x105   : > { %v1499_v35 = vpop.permute.xlu1 %1498  ;;  %v529_v36 = vpack.c.bf16 %v526_v30, %v525_v29  ;;  %v495_v41 = vadd.f32 %v1168_v34, %v463_v38  ;;  %v496_v43 = vadd.f32 %v1169_v33, %v464_v37  ;;  %v1542_v38 = vld [vmem:[#allocation5 + $0xf0] sm:$0xff]  }
 0x106   : > { %v1501_v39 = vunpack.i.h.bf16 %v1499_v35  ;;  %v1500_v40 = vunpack.i.l.bf16 %v1499_v35 }
 0x107   : > { %1302 = vmatprep.mubr.bf16.mxu1 %v529_v36 }
 0x108   : > { %vm516_vm2 = vcmp.eq.f32.partialorder %v1938_v42, %v1501_v39  ;;  %vm515_vm3 = vcmp.eq.f32.partialorder %v1938_v42, %v1500_v40  ;;  %v1529_v42 = vld [vmem:[#allocation5 + $0x88] sm:$0xff]   ;;  %v1543_v39 = vld [vmem:[#allocation5 + $0xf8] sm:$0xff]   ;;  %v1191_v40 = vld [vmem:[#allocation7 + $0x5] ss:$0 sm:$0xff] }
 0x109   : > { %v1173_v44 = vsel %vm516_vm2, 1.0, %v1714_v49  ;;  %v1172_v45 = vsel %vm515_vm3, 1.0, %v1714_v49  ;;  %v1530_v49 = vld [vmem:[#allocation5 + $0x90] sm:$0xff]  }
 0x10a   : > { %v527_v46 = vadd.f32 %v1172_v45, %v495_v41  ;;  %v528_v47 = vadd.f32 %v1173_v44, %v496_v43 }
 0x10c   : > { %v530_v48 = vpack.c.bf16 %v528_v47, %v527_v46 }
 0x10e   : > { %1303 = vmatmul.mubr.bf16.vlgmr.msra.gmra.mrb[0].mxu1 %v530_v48 }
 0x10f   : > { %1327 = vmatpush3.bf16.msra.mxu1 %v1528_v56 }
 0x110   : > { %1328 = vmatprep.subr.bf16.mxu1 %v1529_v42 }
 0x113   : > { %1329 = vmatpush3.bf16.msra.mxu1 %v1529_v42  ;;  %v1200_v42 = vld [vmem:[#allocation7 + $0x6] ss:$0 sm:$0xff] }
 0x114   : > { %1330 = vmatprep.subr.bf16.mxu1 %v1530_v49 }
 0x117   : > { %1331 = vmatpush3.bf16.msra.mxu1 %v1530_v49 }
 0x118   : > { %1332 = vmatprep.subr.bf16.mxu1 %v1531_v57 }
 0x11b   : > { %1333 = vmatpush3.bf16.msra.mxu1 %v1531_v57 }
 0x11c   : > { %1334 = vmatprep.subr.bf16.mxu1 %v1532_v58 }
 0x11f   : > { %1335 = vmatpush3.bf16.msra.mxu1 %v1532_v58 }
 0x120   : > { %1336 = vmatprep.subr.bf16.mxu1 %v1533_v59 }
 0x123   : > { %1337 = vmatpush3.bf16.msra.mxu1 %v1533_v59 }
 0x124   : > { %1338 = vmatprep.subr.bf16.mxu1 %v1534_v15 }
 0x127   : > { %1339 = vmatpush3.bf16.msra.mxu1 %v1534_v15 }
 0x128   : > { %1340 = vmatprep.subr.bf16.mxu1 %v1535_v16 }
 0x12b   : > { %1341 = vmatpush3.bf16.msra.mxu1 %v1535_v16 }
 0x160   : > { %v1284_v50 = vpop.f32.mrb[0].mxu0 }
 0x161   : > { %v338_v52 = vpop.f32.mrb[1].mxu0  ;;  %v347_v61 = vadd.f32 %v1284_v50, %v1143_v60 }
 0x162   : > { %v1285_v53 = vpop.f32.mrb[2].mxu0  ;;  %v339_v62 = vadd.f32 %v1143_v60, %v338_v52 }
 0x163   : > { %v341_v54 = vpop.f32.mrb[3].mxu0  ;;  %v355_v63 = vmax.f32 %v347_v61, 0.0  ;;  %v350_v0 = vadd.f32 %v1285_v53, %v1143_v60 }
 0x164   : > { %v353_v1 = vmax.f32 %v339_v62, 0.0  ;;  %v342_v2 = vadd.f32 %v1143_v60, %v341_v54 }
 0x165   : > { %v356_v4 = vmax.f32 %v350_v0, 0.0 }
 0x166   : > { %v354_v7 = vmax.f32 %v342_v2, 0.0 }
 0x1e1   : > { %v1304_v3 = vpop.f32.mrb[0].mxu1 }
 0x1e2   : > { %v639_v5 = vadd.f32 %v1304_v3, %v355_v63  ;;  %v630_v6 = vpop.f32.mrb[1].mxu1 }
 0x1e3   : > { %v631_v8 = vadd.f32 %v630_v6, %v353_v1  ;;  %v1305_v9 = vpop.f32.mrb[2].mxu1 }
 0x1e4   : > { %v642_v10 = vadd.f32 %v1305_v9, %v356_v4  ;;  %v633_v11 = vpop.f32.mrb[3].mxu1 }
 0x1e5   : > { %v634_v12 = vadd.f32 %v633_v11, %v354_v7 }
 0x1e6   : > { %v646_v13 = vpack.c.bf16 %v642_v10, %v639_v5 }
 0x1e7   : > { %v645_v14 = vpack.c.bf16 %v634_v12, %v631_v8 }
 0x1e9   : > { %1322 = vmatprep.mubr.bf16.mxu0 %v645_v14 }
 0x1ea   : > { %1323 = vmatmul.mubr.bf16.vlgmr.msra.gmra.mrb[4].mxu0 %v646_v13 }
 0x1eb   : > { %1347 = vmatpush3.bf16.msra.mxu0 %v1536_v17 }
 0x1ec   : > { %1348 = vmatprep.subr.bf16.mxu0 %v1537_v18 }
 0x1ef   : > { %1349 = vmatpush3.bf16.msra.mxu0 %v1537_v18 }
 0x1f0   : > { %1350 = vmatprep.subr.bf16.mxu0 %v1538_v19 }
 0x1f3   : > { %1351 = vmatpush3.bf16.msra.mxu0 %v1538_v19 }
 0x1f4   : > { %1352 = vmatprep.subr.bf16.mxu0 %v1539_v20 }
 0x1f7   : > { %1353 = vmatpush3.bf16.msra.mxu0 %v1539_v20 }
 0x1f8   : > { %1354 = vmatprep.subr.bf16.mxu0 %v1540_v21 }
 0x1fb   : > { %1355 = vmatpush3.bf16.msra.mxu0 %v1540_v21 }
 0x1fc   : > { %1356 = vmatprep.subr.bf16.mxu0 %v1541_v22 }
 0x1ff   : > { %1357 = vmatpush3.bf16.msra.mxu0 %v1541_v22 }
 0x200   : > { %1358 = vmatprep.subr.bf16.mxu0 %v1542_v38 }
 0x203   : > { %1359 = vmatpush3.bf16.msra.mxu0 %v1542_v38 }
 0x204   : > { %1360 = vmatprep.subr.bf16.mxu0 %v1543_v39 }
 0x207   : > { %1361 = vmatpush3.bf16.msra.mxu0 %v1543_v39 }
 0x2bd   : > { %v1324_v24 = vpop.f32.mrb[4].mxu0 }
 0x2be   : > { %v760_v25 = vadd.f32 %v1324_v24, %v1182_v23  ;;  %v751_v26 = vpop.f32.mrb[5].mxu0 }
 0x2bf   : > { %v752_v27 = vadd.f32 %v1182_v23, %v751_v26  ;;  %v1325_v28 = vpop.f32.mrb[6].mxu0 }
 0x2c0   : > { %v763_v29 = vadd.f32 %v1325_v28, %v1182_v23  ;;  %v754_v30 = vpop.f32.mrb[7].mxu0  ;;  %v768_v32 = vmax.f32 %v760_v25, 0.0 }
 0x2c1   : > { %v755_v31 = vadd.f32 %v1182_v23, %v754_v30  ;;  %v766_v34 = vmax.f32 %v752_v27, 0.0 }
 0x2c2   : > { %v769_v33 = vmax.f32 %v763_v29, 0.0 }
 0x2c3   : > { %v767_v35 = vmax.f32 %v755_v31, 0.0 }
 0x2c4   : > { %v771_v36 = vpack.c.bf16 %v769_v33, %v768_v32 }
 0x2c5   : > { %v770_v37 = vpack.c.bf16 %v767_v35, %v766_v34 }
 0x2c7   : > { %1342 = vmatprep.mubr.bf16.mxu1 %v770_v37 }
 0x2c8   : > { %1343 = vmatmul.mubr.bf16.vlgmr.msra.gmra.mrb[4].mxu1 %v771_v36 }
 0x39b   : > { %v1344_v41 = vpop.f32.mrb[4].mxu1 }
 0x39c   : > { %v885_v43 = vadd.f32 %v1344_v41, %v1191_v40  ;;  %v876_v44 = vpop.f32.mrb[5].mxu1 }
 0x39d   : > { %v877_v45 = vadd.f32 %v1191_v40, %v876_v44  ;;  %v1345_v46 = vpop.f32.mrb[6].mxu1 }
 0x39e   : > { %v888_v47 = vadd.f32 %v1345_v46, %v1191_v40  ;;  %v879_v48 = vpop.f32.mrb[7].mxu1  ;;  %v893_v51 = vmax.f32 %v885_v43, 0.0 }
 0x39f   : > { %v880_v50 = vadd.f32 %v1191_v40, %v879_v48  ;;  %v891_v53 = vmax.f32 %v877_v45, 0.0 }
 0x3a0   : > { %v894_v52 = vmax.f32 %v888_v47, 0.0 }
 0x3a1   : > { %v892_v54 = vmax.f32 %v880_v50, 0.0 }
 0x3a2   : > { %v896_v55 = vpack.c.bf16 %v894_v52, %v893_v51 }
 0x3a3   : > { %v895_v56 = vpack.c.bf16 %v892_v54, %v891_v53 }
 0x3a5   : > { %1362 = vmatprep.mubr.bf16.mxu0 %v895_v56 }
 0x3a6   : > { %1363 = vmatmul.mubr.bf16.vlgmr.msra.gmra.mrb[8].mxu0 %v896_v55 }
 0x479   : > { %v1364_v49 = vpop.f32.mrb[8].mxu0 }
 0x47a   : > { %v1010_v57 = vadd.f32 %v1364_v49, %v1200_v42  ;;  %v1001_v58 = vpop.f32.mrb[9].mxu0 }
 0x47b   : > { %v1002_v59 = vadd.f32 %v1200_v42, %v1001_v58  ;;  %v1365_v60 = vpop.f32.mrb[10].mxu0 }
 0x47c   : > { %v1018_v61 = vmax.f32 %v1010_v57, 0.0  ;;  %v1013_v62 = vadd.f32 %v1365_v60, %v1200_v42  ;;  %v1004_v63 = vpop.f32.mrb[11].mxu0 }
 0x47d   : > { %v1016_v0 = vmax.f32 %v1002_v59, 0.0  ;;  %v1005_v1 = vadd.f32 %v1200_v42, %v1004_v63 }
 0x47e   : > { %1022 = vst [vmem:[%s215_s20 + $0x10] sm:$0xff] %v1018_v61  ;;  %v1019_v2 = vmax.f32 %v1013_v62, 0.0 }
 0x47f   : > { %1020 = vst [vmem:[%s215_s20] sm:$0xff] %v1016_v0  ;;  %v1017_v3 = vmax.f32 %v1005_v1, 0.0 }
 0x480   : > { %1023 = vst [vmem:[%s215_s20 + $0x18] sm:$0xff] %v1019_v2 }
 0x481   : > { %1021 = vst [vmem:[%s215_s20 + $0x8] sm:$0xff] %v1017_v3 }
 0x482   : > { %1645 = shalt.err (!%p1642_p1)
}
 0x483   : > { %s1646_s17 = scalar_lea.hbm %s2011_s28, 512  ;;  %s1650_s30 = scalar_lea.hbm %s2058_s3, 1024 }
 0x484   : > { %p1647_p13 = scmp.ne.s32.totalorder %s2011_s28, %s1646_s17  ;;  %p1651_p4 = scmp.lt.u32.totalorder %s2011_s28, %s2058_s3 }
 0x485   : > { %p1652_p5 = scmp.lt.u32.totalorder %s1650_s30, %s1646_s17  ;;  %p1654_p8 = scmp.lt.u32.totalorder %s1646_s17, %s2011_s28 }
 0x486   : > { %p1648_p6 = pnand %p1647_p13, %p2080_p0 }
 0x487   : > { %p1653_p11 = por %p1652_p5, %p1651_p4 }
 0x488   : > { %p1649_p10 = pneg %p1648_p6 }
 0x489   : > { %p1655_p2 = por %p1654_p8, %p1653_p11 }
 0x48b   : > { %p1656_p3 = pnand %p1655_p2, %p1649_p10 }
 0x48d   : > { %1659 = shalt.err (!%p1656_p3)
}
 0x48e   : > { %s1716_s18 = smov 128   ;;  %s1717_s20 = smov 8  }
 0x48f   : > { %1376 = dma.vmem_to_hbm [thread:$0]  (%p2080_p0), %s2006_s7, 512, %s2011_s28, %s1025_s16, %s1716_s18, %s1716_s18, %s1717_s20  }
 0x490 PF: > { %s1053_s8 = sand.u32 1, %s1690_s12   ;;  %p2081_p7 = scmp.ne.s32.totalorder %s2063_s19, 0 }
 0x491   : > { %p2082_p9 = scmp.ge.s32.totalorder %s1702_s15, 2  ;;  %s1054_s24 = scalar_lea.sflag [#allocation4], %s1053_s8 }
 0x493   : > { %p1390_p12 = pnand %p2082_p9, %p2081_p7 }
 0x495   : > { %1685 = dma.done.wait (!%p1390_p12), %s1054_s24, 512  }
 0x496   : > { %1687 = vsyncadd (!%p1390_p12), %s1054_s24, 4294966784  ;;  %p17_p1 = scmp.ge.s32.totalorder %s1851_s4, 4   ;;  %s2083_s12 = smov %s1694_s13 }
 0x497   : > { %s2084_s13 = smov %s1698_s14  ;;  %s2085_s14 = smov %s1867_s9 }
 0x498   : > { %s2086_s15 = smov %s1851_s4  ;;  %19 = sbr.rel (!%p17_p1) target bundleno = 6 (0x6), region = 89 }
 0x49f   :  { %1059 = vsyncpa [#allocation3], 1 }
 0x4a0   :  { %1061 = vsyncpa [#allocation3 + $0x1], 1 }
 0x4a1   :  { %1062 = vsyncpa [#allocation6], 1 }
 0x4a2   :  { %1063 = vsyncpa [#allocation4], 1 }
 0x4a3   :  { %1065 = vsyncpa [#allocation4 + $0x1], 1 }

</bundles_post_ra>
